<compile_context>
chip_gen: v7x
topology: tpu7x:2x2x1
jax: 0.10.0
libtpu: 0.0.40
codegen_flags: <defaults>
</compile_context>

<pallas_src>
import functools

import jax
import jax.numpy as jnp
from jax.experimental import pallas as pl
from jax.experimental.pallas import tpu as pltpu


def _voting_kernel(x_ref, w_ref, o_ref, *, precision):
    # x_ref: (TILE_N, C) input tile in its native dtype; w_ref: (C, OUT) averaging
    # matrix (same dtype as x); o_ref: (TILE_N, OUT).  Single MXU matmul, f32 accumulate.
    o_ref[...] = jnp.dot(
        x_ref[...],
        w_ref[...],
        preferred_element_type=jnp.float32,
        precision=precision,
    ).astype(o_ref.dtype)


@functools.lru_cache(maxsize=None)
def _avg_matrix(c: int, voter_num: int, dtype_name: str):
    """Block-diagonal averaging matrix W[ch, o] = 1/V if channel ch is in output group o.

    Remainder channels (ch >= out*V) map to no group -> weight 0, matching AvgPool1d's
    remainder-dropping, so no wrapper-side slice copy is needed.
    """
    out = c // voter_num
    ch = jnp.arange(c)[:, None]
    grp = jnp.arange(out)[None, :]
    w = jnp.where(ch // voter_num == grp, 1.0 / voter_num, 0.0)
    return w.astype(jnp.dtype(dtype_name))


def _round_up(v: int, m: int) -> int:
    return ((v + m - 1) // m) * m


def voting_layer(x: jax.Array, voter_num: int, *, tile_n: int = 4096) -> jax.Array:
    """Pallas implementation of VotingLayer.forward: (N, C) -> (N, C // voter_num)."""
    n, c = x.shape
    out = c // voter_num
    if out == 0 or n == 0:
        # Degenerate shapes (c < voter_num, or empty batch): AvgPool1d yields an empty
        # feature axis; a zero-sized pallas_call is not worth launching.
        return jnp.zeros((n, out), dtype=x.dtype)

    # Averaging matrix in the input dtype (avoids silent f32 promotion of bf16 inputs).
    w = _avg_matrix(c, voter_num, jnp.dtype(x.dtype).name)

    # HIGHEST (multi-pass f32 MXU) only where it buys exactness; bf16 gets the
    # single-pass DEFAULT path.
    if x.dtype == jnp.float32:
        precision = jax.lax.Precision.HIGHEST
    else:
        precision = jax.lax.Precision.DEFAULT

    # Row tile: multiple of 8, at most tile_n.  On large batches keep >= 2 grid steps so
    # the "parallel" N axis can shard across v7x's 2 TensorCores.
    tn = min(tile_n, _round_up(max(n, 1), 8))
    if n >= 1024:
        tn = min(tn, _round_up(pl.cdiv(n, 2), 8))
    grid = (pl.cdiv(n, tn),)

    # Cost hint: this is a tiny, HBM-bound op.
    itemsize = jnp.dtype(x.dtype).itemsize
    cost = pl.CostEstimate(
        flops=2 * n * c * out,
        transcendentals=0,
        bytes_accessed=n * c * itemsize + n * out * itemsize + c * out * itemsize,
    )

    # Scoped-VMEM estimate (lane dims pad to 128, double-buffered in/out tiles).
    vmem_bytes = 2 * (tn * _round_up(c, 128) + tn * _round_up(out, 128)) * 4 \
        + 2 * _round_up(c, 8) * _round_up(out, 128) * 4
    vmem_limit = None
    if tn > 4096:
        # Only needed when callers push the tile past the v5e 16 MiB scoped default.
        vmem_limit = min(int(vmem_bytes * 1.25) + (1 << 20), 100 << 20)

    return pl.pallas_call(
        functools.partial(_voting_kernel, precision=precision),
        out_shape=jax.ShapeDtypeStruct((n, out), x.dtype),
        grid=grid,
        in_specs=[
            pl.BlockSpec((tn, c), lambda i: (i, 0)),    # row tile, full channel dim
            pl.BlockSpec((c, out), lambda i: (0, 0)),   # tiny matrix, VMEM-resident
        ],
        out_specs=pl.BlockSpec((tn, out), lambda i: (i, 0)),
        compiler_params=pltpu.CompilerParams(
            dimension_semantics=("parallel",),
            vmem_limit_bytes=vmem_limit,
        ),
        cost_estimate=cost,
    )(x, w)


if __name__ == "__main__":
    # DVS-Gesture-style setup: 11 classes, 10 voters per class -> C = 110.
    voter_num = 10
    num_classes = 11
    c = num_classes * voter_num  # 110

    def ref(xx):
        nn_ = xx.shape[0]
        return (
            xx[:, : num_classes * voter_num]
            .astype(jnp.float32)
            .reshape(nn_, num_classes, voter_num)
            .mean(axis=-1)
        )

    # Small deterministic f32 batch (single grid step).
    key = jax.random.PRNGKey(0)
    x_small = jax.random.normal(key, (16, c), dtype=jnp.float32)
    y_small = voting_layer(x_small, voter_num)
    jax.block_until_ready(y_small)
    assert y_small.shape == (16, num_classes), y_small.shape
    assert jnp.allclose(y_small, ref(x_small), atol=1e-5, rtol=1e-5), "small f32 mismatch"

    # Larger f32 batch exercising the >=2-step (dual-TensorCore) path.
    x_big = jax.random.normal(jax.random.PRNGKey(1), (2048, c), dtype=jnp.float32)
    y_big = voting_layer(x_big, voter_num)
    jax.block_until_ready(y_big)
    assert y_big.shape == (2048, num_classes), y_big.shape
    assert jnp.allclose(y_big, ref(x_big), atol=1e-5, rtol=1e-5), "big f32 mismatch"

    # bf16 batch: single-pass MXU path; tolerance relaxed for bf16 inputs/weights
    # (argmax-level voting is unaffected).
    x_bf16 = jax.random.normal(jax.random.PRNGKey(2), (16, c), dtype=jnp.float32).astype(
        jnp.bfloat16
    )
    y_bf16 = voting_layer(x_bf16, voter_num)
    jax.block_until_ready(y_bf16)
    assert y_bf16.shape == (16, num_classes), y_bf16.shape
    assert jnp.allclose(
        y_bf16.astype(jnp.float32), ref(x_bf16), atol=2e-2, rtol=2e-2
    ), "bf16 mismatch"

    print("KERNEL_OK")
</pallas_src>

<mosaic_0001>
module attributes {stable_mosaic.version = 11 : i64} {
  func.func @_voting_kernel(%arg0: i32, %arg1: memref<16x110xf32, #tpu.memory_space<vmem>>, %arg2: memref<110x11xf32, #tpu.memory_space<vmem>>, %arg3: memref<16x11xf32, #tpu.memory_space<vmem>>) attributes {dimension_semantics = [#tpu.dimension_semantics<parallel>], iteration_bounds = array<i64: 1>, scalar_prefetch = 0 : i64, scratch_operands = 0 : i64, tpu.core_type = #tpu.core_type<tc>, window_params = [{transform_indices = @transform_0, window_bounds = array<i64: 16, 110>}, {pipeline_mode = #tpu.pipeline_mode<synchronous>, transform_indices = @transform_1, window_bounds = array<i64: 110, 11>}, {transform_indices = @transform_2, window_bounds = array<i64: 16, 11>}]} {
    %c0 = arith.constant 0 : index
    %c0_0 = arith.constant 0 : index
    %0 = vector.load %arg1[%c0, %c0_0] : memref<16x110xf32, #tpu.memory_space<vmem>>, vector<16x110xf32>
    %c0_1 = arith.constant 0 : index
    %c0_2 = arith.constant 0 : index
    %1 = vector.load %arg2[%c0_1, %c0_2] : memref<110x11xf32, #tpu.memory_space<vmem>>, vector<110x11xf32>
    %cst = arith.constant dense<0.000000e+00> : vector<16x11xf32>
    %2 = tpu.matmul %0, %1, %cst {dimension_numbers = #tpu.dot_dimension_numbers<[1], [0], [0], [1], [0, 0, 1, 1], [], []>, precision = #tpu.contract_precision<fp32>} : vector<16x110xf32>, vector<110x11xf32>, vector<16x11xf32> -> vector<16x11xf32>
    %c0_3 = arith.constant 0 : index
    %c0_4 = arith.constant 0 : index
    %3 = vector.load %arg3[%c0_3, %c0_4] : memref<16x11xf32, #tpu.memory_space<vmem>>, vector<16x11xf32>
    tpu.vector_store %arg3[%c0_3, %c0_4], %2 {strides = array<i32>} : memref<16x11xf32, #tpu.memory_space<vmem>>, vector<16x11xf32>,
    return
  }
  func.func @transform_0(%arg0: i32) -> (i32, i32) {
    %c0_i32 = arith.constant 0 : i32
    %c0_i32_0 = arith.constant 0 : i32
    return %arg0, %c0_i32 : i32, i32
  }
  func.func @transform_1(%arg0: i32) -> (i32, i32) {
    %c0_i32 = arith.constant 0 : i32
    %c0_i32_0 = arith.constant 0 : i32
    %c0_i32_1 = arith.constant 0 : i32
    return %c0_i32, %c0_i32_0 : i32, i32
  }
  func.func @transform_2(%arg0: i32) -> (i32, i32) {
    %c0_i32 = arith.constant 0 : i32
    %c0_i32_0 = arith.constant 0 : i32
    return %arg0, %c0_i32 : i32, i32
  }
}

</mosaic_0001>

<bundles_post_ra>
// kernel: tpu_custom_call.1
= control target key start
LH: loop header
LB: loop body
LE: loop exit
PB: predicated region body
PF: predicated region fallthrough
CT: control target
= control target key end

     0   :  { %vm28_vm0 = vcmask 900096   ;;  %s1500_s0 = inlined_call_operand.vmem [shape: f32[16,110], index: 0, kind: input, shape index: {}]   ;;  %s1501_s1 = inlined_call_operand.vmem [shape: f32[110,11], index: 1, kind: input, shape index: {}]   ;;  %s1502_s2 = inlined_call_operand.hbm [shape: f32[16,11], index: 2, kind: output, shape index: {}]  }
   0x1   :  { %v14_v0 = vld [vmem:[%s1501_s1] sm:$0xff]  ;;  %v15_v1 = vld [vmem:[%s1501_s1 + $0x8] sm:$0xff]  ;;  %v16_v2 = vld [vmem:[%s1501_s1 + $0x10] sm:$0xff] }
   0x2   :  { %v40_v3 = vand.u32 4294901760, %v14_v0  ;;  %v43_v4 = vand.u32 4294901760, %v15_v1  ;;  %v17_v5 = vld [vmem:[%s1501_s1 + $0x18] sm:$0xff]  ;;  %v46_v6 = vand.u32 4294901760, %v16_v2  ;;  %v18_v7 = vld [vmem:[%s1501_s1 + $0x20] sm:$0xff]  ;;  %v1239_v8 = vld [vmem:[%s1501_s1 + $0x28] sm:$0xff] }
   0x3   :  { %v49_v9 = vand.u32 4294901760, %v17_v5  ;;  %v52_v11 = vand.u32 4294901760, %v18_v7  ;;  %v55_v12 = vand.u32 4294901760, %v1239_v8  ;;  %v1249_v14 = vld [vmem:[%s1501_s1 + $0x30] sm:$0xff]  ;;  %v1254_v15 = vld [vmem:[%s1501_s1 + $0x38] sm:$0xff]  ;;  %v12_v16 = vld [vmem:[%s1500_s0] sm:$0xff] }
   0x4   :  { %v1241_v10 = vpack.c.bf16 %v43_v4, %v40_v3 }
   0x5   :  { %v1244_v13 = vpack.c.bf16 %v49_v9, %v46_v6 }
   0x6   :  { %999 = vmatprep.subr.bf16.mxu1 %v1241_v10  ;;  %1083 = vmatprep.subr.bf16.mxu0 %v1241_v10 }
   0x7   :  { %7 = vsyncpa [#allocation3], 0  ;;  %1001 = vmatpush3.bf16.msra.mxu1 %v1241_v10  ;;  %1085 = vmatpush3.bf16.msra.mxu0 %v1241_v10  ;;  %v30_v17 = vsel %vm28_vm0, %v12_v16, 0  ;;  %v1268_v18 = vpack.c.bf16 %v55_v12, %v52_v11  ;;  %v58_v19 = vand.u32 4294901760, %v1249_v14  ;;  %v61_v20 = vand.u32 4294901760, %v1254_v15  ;;  %v1275_v21 = vld [vmem:[%s1501_s1 + $0x40] sm:$0xff] }
   0x8   :  { %1003 = vmatprep.subr.bf16.mxu1 %v1244_v13  ;;  %1087 = vmatprep.subr.bf16.mxu0 %v1244_v13  ;;  %v1280_v22 = vld [vmem:[%s1501_s1 + $0x48] sm:$0xff]  ;;  %v1285_v24 = vand.u32 4294901760, %v30_v17  ;;  %v64_v26 = vand.u32 4294901760, %v1275_v21  ;;  %v1297_v28 = vld [vmem:[%s1501_s1 + $0x50] sm:$0xff]  ;;  %vm35_vm1 = vcmask 1045504   ;;  %v1311_v31 = vld [vmem:[%s1501_s1 + $0x58] sm:$0xff]  ;;  %v1317_v34 = vsub.f32 %v14_v0, %v40_v3 }
   0x9   :  { %v13_v23 = vld [vmem:[%s1500_s0 + $0x8] sm:$0xff]  ;;  %v67_v27 = vand.u32 4294901760, %v1280_v22  ;;  %v1306_v30 = vpack.c.bf16 %v61_v20, %v58_v19  ;;  %v1319_v35 = vsub.f32 %v15_v1, %v43_v4  ;;  %v70_v36 = vand.u32 4294901760, %v1297_v28  ;;  %v1331_v40 = vld [vmem:[%s1501_s1 + $0x60] sm:$0xff] }
   0xa   :  { %v1288_v25 = vsub.f32 %v30_v17, %v1285_v24  ;;  %v33_v29 = vsel %vm28_vm0, %v13_v23, 0  ;;  %v27_v32 = vld [vmem:[%s1501_s1 + $0x68] sm:$0x3f]  ;;  %v73_v39 = vand.u32 4294901760, %v1311_v31  ;;  %v1336_v42 = vsub.f32 %v16_v2, %v46_v6  ;;  %s1203_s1 = smov [#allocation2]  }
   0xb   :  { %1005 = vmatpush3.bf16.msra.mxu1 %v1244_v13  ;;  %1089 = vmatpush3.bf16.msra.mxu0 %v1244_v13  ;;  %v1323_v38 = vand.u32 4294901760, %v33_v29  ;;  %v1334_v41 = vsel %vm35_vm1, %v27_v32, 0  ;;  %v1338_v43 = vsub.f32 %v17_v5, %v49_v9  ;;  %v1346_v44 = vpack.c.bf16 %v67_v27, %v64_v26  ;;  %s705_s12 = sshll.u32 %s1203_s1, 4  ;;  %s706_s12 = int_to_ptr.vmem [resolvable:$true] %s705_s12 }
   0xc   :  { %1007 = vmatprep.subr.bf16.mxu1 %v1268_v18  ;;  %1091 = vmatprep.subr.bf16.mxu0 %v1268_v18  ;;  %v120_v33 = vand.u32 4294901760, %v1288_v25  ;;  %v141_v46 = vand.u32 4294901760, %v1317_v34  ;;  %v148_v47 = vand.u32 4294901760, %v1319_v35  ;;  %v76_v48 = vand.u32 4294901760, %v1331_v40  ;;  %s1179_s13 = scalar_lea.vmem %s706_s12, 256  ;;  %p1184_p1 = scmp.lt.s32.totalorder %s706_s12, %s706_s12 }
   0xd   :  { %v1352_v49 = vsub.f32 %v33_v29, %v1323_v38  ;;  %v1354_v50 = vsub.f32 %v18_v7, %v52_v11  ;;  %v79_v51 = vand.u32 4294901760, %v1334_v41  ;;  %v155_v52 = vand.u32 4294901760, %v1336_v42  ;;  %p1180_p0 = scmp.ne.s32.totalorder %s706_s12, %s1179_s13  ;;  %p1185_p2 = scmp.lt.s32.totalorder %s1179_s13, %s1179_s13 }
   0xe   :  { %v121_v37 = vsub.f32 %v1288_v25, %v120_v33  ;;  %933 = vmatprep.mubr.f32.mxu0 %v120_v33  ;;  %v162_v53 = vand.u32 4294901760, %v1338_v43  ;;  %v1364_v54 = vsub.f32 %v1239_v8, %v55_v12  ;;  %v1372_v55 = vpack.c.bf16 %v73_v39, %v70_v36 }
   0xf   :  { %1009 = vmatpush3.bf16.msra.mxu1 %v1268_v18  ;;  %1093 = vmatpush3.bf16.msra.mxu0 %v1268_v18  ;;  %v142_v56 = vsub.f32 %v1317_v34, %v141_v46  ;;  %v149_v57 = vsub.f32 %v1319_v35, %v148_v47  ;;  %v130_v58 = vand.u32 4294901760, %v1352_v49  ;;  %v169_v59 = vand.u32 4294901760, %v1354_v50  ;;  %p1186_p3 = por %p1185_p2, %p1184_p1 }
  0x10   :  { %1011 = vmatprep.subr.bf16.mxu1 %v1306_v30  ;;  %1095 = vmatprep.subr.bf16.mxu0 %v1306_v30  ;;  %v122_v45 = vand.u32 4294901760, %v121_v37  ;;  %v1382_v60 = vpack.c.bf16 %v79_v51, %v76_v48  ;;  %v156_v61 = vsub.f32 %v1336_v42, %v155_v52  ;;  %v163_v62 = vsub.f32 %v1338_v43, %v162_v53 }
  0x11   :  { %v176_v63 = vand.u32 4294901760, %v1364_v54  ;;  %v143_v0 = vand.u32 4294901760, %v142_v56  ;;  %v150_v1 = vand.u32 4294901760, %v149_v57  ;;  %v1392_v2 = vsub.f32 %v1249_v14, %v58_v19  ;;  %p1187_p4 = pnand %p1186_p3, %p1180_p0 }
  0x12   :  { %840 = vmatprep.mubr.f32.mxu1 %v122_v45  ;;  %v1397_v3 = vsub.f32 %v1254_v15, %v61_v20  ;;  %v1110_v4 = vpack.c.bf16 %v148_v47, %v141_v46  ;;  %v131_v5 = vsub.f32 %v1352_v49, %v130_v58  ;;  %v170_v6 = vsub.f32 %v1354_v50, %v169_v59 }
  0x13   :  { %1013 = vmatpush3.bf16.msra.mxu1 %v1306_v30  ;;  %1097 = vmatpush3.bf16.msra.mxu0 %v1306_v30  ;;  %v157_v7 = vand.u32 4294901760, %v156_v61  ;;  %v164_v8 = vand.u32 4294901760, %v163_v62  ;;  %v177_v9 = vsub.f32 %v1364_v54, %v176_v63  ;;  %v1407_v11 = vsub.f32 %v1275_v21, %v64_v26 }
  0x14   :  { %1015 = vmatprep.subr.bf16.mxu1 %v1346_v44  ;;  %1099 = vmatprep.subr.bf16.mxu0 %v1346_v44  ;;  %v1026_v12 = vpack.c.bf16 %v150_v1, %v143_v0  ;;  %v183_v14 = vand.u32 4294901760, %v1392_v2  ;;  %v190_v15 = vand.u32 4294901760, %v1397_v3  ;;  %v1416_v16 = vsub.f32 %v1280_v22, %v67_v27 }
  0x15   :  { %v132_v17 = vand.u32 4294901760, %v131_v5  ;;  %v1114_v19 = vpack.c.bf16 %v162_v53, %v155_v52  ;;  %v171_v20 = vand.u32 4294901760, %v170_v6  ;;  %v178_v21 = vand.u32 4294901760, %v177_v9 }
  0x16   :  { %v197_v23 = vand.u32 4294901760, %v1407_v11  ;;  %v1424_v26 = vsub.f32 %v1297_v28, %v70_v36  ;;  %v1429_v22 = vsub.f32 %v1311_v31, %v73_v39  ;;  %v1030_v27 = vpack.c.bf16 %v164_v8, %v157_v7 }
  0x17   :  { %1017 = vmatpush3.bf16.msra.mxu1 %v1346_v44  ;;  %1101 = vmatpush3.bf16.msra.mxu0 %v1346_v44  ;;  %v184_v29 = vsub.f32 %v1392_v2, %v183_v14  ;;  %v191_v32 = vsub.f32 %v1397_v3, %v190_v15  ;;  %v204_v33 = vand.u32 4294901760, %v1416_v16  ;;  %v1118_v37 = vpack.c.bf16 %v176_v63, %v169_v59 }
  0x18   :  { %1019 = vmatprep.subr.bf16.mxu1 %v1372_v55  ;;  %1103 = vmatprep.subr.bf16.mxu0 %v1372_v55  ;;  %v1435_v28 = vsub.f32 %v1331_v40, %v76_v48  ;;  %v1034_v36 = vpack.c.bf16 %v178_v21, %v171_v20  ;;  %v198_v31 = vsub.f32 %v1407_v11, %v197_v23  ;;  %v211_v39 = vand.u32 4294901760, %v1424_v26 }
  0x19   :  { %v218_v45 = vand.u32 4294901760, %v1429_v22  ;;  %v185_v46 = vand.u32 4294901760, %v184_v29  ;;  %v192_v47 = vand.u32 4294901760, %v191_v32  ;;  %v205_v52 = vsub.f32 %v1416_v16, %v204_v33 }
  0x1a   :  { %v1444_v40 = vsub.f32 %v1334_v41, %v79_v51  ;;  %v1122_v48 = vpack.c.bf16 %v190_v15, %v183_v14  ;;  %v199_v53 = vand.u32 4294901760, %v198_v31  ;;  %v212_v56 = vsub.f32 %v1424_v26, %v211_v39 }
  0x1b   :  { %1021 = vmatpush3.bf16.msra.mxu1 %v1372_v55  ;;  %1105 = vmatpush3.bf16.msra.mxu0 %v1372_v55  ;;  %v219_v57 = vsub.f32 %v1429_v22, %v218_v45  ;;  %v206_v59 = vand.u32 4294901760, %v205_v52  ;;  %v225_v61 = vand.u32 4294901760, %v1435_v28  ;;  %v1126_v51 = vpack.c.bf16 %v204_v33, %v197_v23 }
  0x1c   :  { %1023 = vmatprep.subr.bf16.mxu1 %v1382_v60  ;;  %1107 = vmatprep.subr.bf16.mxu0 %v1382_v60  ;;  %v232_v41 = vand.u32 4294901760, %v1444_v40  ;;  %v213_v62 = vand.u32 4294901760, %v212_v56  ;;  %v1130_v6 = vpack.c.bf16 %v218_v45, %v211_v39  ;;  %v1054_v14 = vpack.c.bf16 %v1319_v35, %v1317_v34 }
  0x1d   :  { %v1042_v63 = vpack.c.bf16 %v206_v59, %v199_v53  ;;  %v220_v0 = vand.u32 4294901760, %v219_v57  ;;  %v226_v1 = vsub.f32 %v1435_v28, %v225_v61  ;;  %v1058_v15 = vpack.c.bf16 %v1338_v43, %v1336_v42 }
  0x1e   :  { %v1062_v34 = vpack.c.bf16 %v1364_v54, %v1354_v50  ;;  %v1066_v35 = vpack.c.bf16 %v1397_v3, %v1392_v2  ;;  %vm697_vm2 = vcmask 89088  }
  0x1f   :  { %1025 = vmatpush3.bf16.msra.mxu1 %v1382_v60  ;;  %1109 = vmatpush3.bf16.msra.mxu0 %v1382_v60  ;;  %v1046_v5 = vpack.c.bf16 %v220_v0, %v213_v62  ;;  %v227_v7 = vand.u32 4294901760, %v226_v1 }
  0x20   :  { %1027 = vmatprep.subr.bf16.mxu1 %v1026_v12  ;;  %1111 = vmatprep.subr.bf16.mxu0 %v1110_v4 }
  0x22   :  { %841 = vmatmul.mubr.f32.vlgmr.msra.gmra.mrb[0].mxu1 %v132_v17  ;;  %934 = vmatmul.mubr.f32.vlgmr.msra.gmra.mrb[0].mxu0 %v130_v58  ;;  %v1038_v58 = vpack.c.bf16 %v192_v47, %v185_v46 }
  0x23   :  { %1029 = vmatpush3.bf16.msra.mxu1 %v1026_v12  ;;  %1113 = vmatpush3.bf16.msra.mxu0 %v1110_v4  ;;  %v233_v4 = vsub.f32 %v1444_v40, %v232_v41  ;;  %v1134_v12 = vpack.c.bf16 %v232_v41, %v225_v61 }
  0x24   :  { %1031 = vmatprep.subr.bf16.mxu1 %v1030_v27  ;;  %1115 = vmatprep.subr.bf16.mxu0 %v1114_v19 }
  0x25   :  { %871 = vmatprep.mubr.f32.mxu1 %v1285_v24  ;;  %964 = vmatprep.mubr.f32.mxu0 %v1285_v24  ;;  %v234_v8 = vand.u32 4294901760, %v233_v4 }
  0x27   :  { %1033 = vmatpush3.bf16.msra.mxu1 %v1030_v27  ;;  %1117 = vmatpush3.bf16.msra.mxu0 %v1114_v19  ;;  %v1050_v9 = vpack.c.bf16 %v234_v8, %v227_v7 }
  0x28   :  { %1035 = vmatprep.subr.bf16.mxu1 %v1034_v36  ;;  %1119 = vmatprep.subr.bf16.mxu0 %v1118_v37 }
  0x2b   :  { %1037 = vmatpush3.bf16.msra.mxu1 %v1034_v36  ;;  %1121 = vmatpush3.bf16.msra.mxu0 %v1118_v37 }
  0x2c   :  { %1039 = vmatprep.subr.bf16.mxu1 %v1038_v58  ;;  %1123 = vmatprep.subr.bf16.mxu0 %v1122_v48 }
  0x2f   :  { %1041 = vmatpush3.bf16.msra.mxu1 %v1038_v58  ;;  %1125 = vmatpush3.bf16.msra.mxu0 %v1122_v48 }
  0x30   :  { %1043 = vmatprep.subr.bf16.mxu1 %v1042_v63  ;;  %1127 = vmatprep.subr.bf16.mxu0 %v1126_v51 }
  0x33   :  { %1045 = vmatpush3.bf16.msra.mxu1 %v1042_v63  ;;  %1129 = vmatpush3.bf16.msra.mxu0 %v1126_v51 }
  0x34   :  { %1047 = vmatprep.subr.bf16.mxu1 %v1046_v5  ;;  %1131 = vmatprep.subr.bf16.mxu0 %v1130_v6 }
  0x37   :  { %1049 = vmatpush3.bf16.msra.mxu1 %v1046_v5  ;;  %1133 = vmatpush3.bf16.msra.mxu0 %v1130_v6 }
  0x38   :  { %1051 = vmatprep.subr.bf16.mxu1 %v1050_v9  ;;  %1135 = vmatprep.subr.bf16.mxu0 %v1134_v12 }
  0x3b   :  { %1053 = vmatpush3.bf16.msra.mxu1 %v1050_v9  ;;  %1137 = vmatpush3.bf16.msra.mxu0 %v1134_v12 }
  0x3c   :  { %1055 = vmatprep.subr.bf16.mxu1 %v1054_v14  ;;  %1139 = vmatprep.subr.bf16.mxu0 %v1241_v10 }
  0x3e   :  { %872 = vmatmul.mubr.f32.vlgmr.msra.gmra.mrb[0].mxu1 %v1323_v38  ;;  %965 = vmatmul.mubr.f32.vlgmr.msra.gmra.mrb[0].mxu0 %v1323_v38 }
  0x3f   :  { %1057 = vmatpush3.bf16.msra.mxu1 %v1054_v14  ;;  %1141 = vmatpush3.bf16.msra.mxu0 %v1241_v10  ;;  %v1070_v10 = vpack.c.bf16 %v1416_v16, %v1407_v11 }
  0x40   :  { %1059 = vmatprep.subr.bf16.mxu1 %v1058_v15  ;;  %1143 = vmatprep.subr.bf16.mxu0 %v1244_v13 }
  0x41   :  { %902 = vmatprep.mubr.f32.mxu1 %v1288_v25  ;;  %995 = vmatprep.mubr.f32.mxu0 %v1285_v24 }
  0x43   :  { %1061 = vmatpush3.bf16.msra.mxu1 %v1058_v15  ;;  %1145 = vmatpush3.bf16.msra.mxu0 %v1244_v13  ;;  %v1074_v13 = vpack.c.bf16 %v1429_v22, %v1424_v26 }
  0x44   :  { %1063 = vmatprep.subr.bf16.mxu1 %v1062_v34  ;;  %1147 = vmatprep.subr.bf16.mxu0 %v1268_v18 }
  0x47   :  { %1065 = vmatpush3.bf16.msra.mxu1 %v1062_v34  ;;  %1149 = vmatpush3.bf16.msra.mxu0 %v1268_v18  ;;  %v1078_v18 = vpack.c.bf16 %v1444_v40, %v1435_v28 }
  0x48   :  { %1067 = vmatprep.subr.bf16.mxu1 %v1066_v35  ;;  %1151 = vmatprep.subr.bf16.mxu0 %v1306_v30 }
  0x4b   :  { %1069 = vmatpush3.bf16.msra.mxu1 %v1066_v35  ;;  %1153 = vmatpush3.bf16.msra.mxu0 %v1306_v30 }
  0x4c   :  { %1071 = vmatprep.subr.bf16.mxu1 %v1070_v10  ;;  %1155 = vmatprep.subr.bf16.mxu0 %v1346_v44 }
  0x4f   :  { %1073 = vmatpush3.bf16.msra.mxu1 %v1070_v10  ;;  %1157 = vmatpush3.bf16.msra.mxu0 %v1346_v44 }
  0x50   :  { %1075 = vmatprep.subr.bf16.mxu1 %v1074_v13  ;;  %1159 = vmatprep.subr.bf16.mxu0 %v1372_v55 }
  0x53   :  { %1077 = vmatpush3.bf16.msra.mxu1 %v1074_v13  ;;  %1161 = vmatpush3.bf16.msra.mxu0 %v1372_v55 }
  0x54   :  { %1079 = vmatprep.subr.bf16.mxu1 %v1078_v18  ;;  %1163 = vmatprep.subr.bf16.mxu0 %v1382_v60 }
  0x57   :  { %1081 = vmatpush3.bf16.msra.mxu1 %v1078_v18  ;;  %1165 = vmatpush3.bf16.msra.mxu0 %v1382_v60 }
  0x5a   :  { %903 = vmatmul.mubr.f32.vlgmr.msra.gmra.mrb[0].mxu1 %v1352_v49  ;;  %996 = vmatmul.mubr.f32.vlgmr.msra.gmra.mrb[0].mxu0 %v1323_v38 }
 0x12d   :  { %v904_v24 = vpop.f32.mrb[0].mxu1  ;;  %v997_v25 = vpop.f32.mrb[0].mxu0 }
 0x12e   :  { %v1166_v30 = vadd.f32 %v997_v25, %v904_v24  ;;  %v381_v42 = vpop.f32.mrb[1].mxu1  ;;  %v687_v43 = vpop.f32.mrb[1].mxu0 }
 0x12f   :  { %v1167_v44 = vadd.f32 %v687_v43, %v381_v42 }
 0x130   :  { %699 = vst.msk [vmem:[#allocation2 + $0x8] sm:$0xff] %vm697_vm2, %v1166_v30 }
 0x131   :  { %698 = vst.msk [vmem:[#allocation2] sm:$0xff] %vm697_vm2, %v1167_v44 }
 0x132   :  { %1190 = shalt.err (!%p1187_p4)
}
 0x133   :  { %s1191_s16 = scalar_lea.hbm %s1502_s2, 256 }
 0x134   :  { %p1192_p5 = scmp.ne.s32.totalorder %s1502_s2, %s1191_s16  ;;  %p1195_p6 = scmp.lt.u32.totalorder %s1191_s16, %s1502_s2 }
 0x136   :  { %p1197_p7 = pnand %p1195_p6, %p1192_p5 }
 0x138   :  { %1200 = shalt.err (!%p1197_p7)
}
 0x139   :  { %s1204_s21 = smov 128   ;;  %s1205_s22 = smov 8  }
 0x13a   :  { %711 = dma.vmem_to_hbm [thread:$0]  %s706_s12, 256, %s1502_s2, [#allocation3], %s1204_s21, %s1204_s21, %s1205_s22  }
 0x13b   :  { %1201 = dma.done.wait [#allocation3], 256  }
 0x13c   :  { %1202 = vsyncadd [#allocation3], 4294967040 }
 0x13d   :  { %715 = vsyncpa [#allocation3], 1 }

</bundles_post_ra>
